<compile_context>
chip_gen: v7x
topology: tpu7x:2x2x1
jax: 0.10.0
libtpu: 0.0.40
codegen_flags: <defaults>
</compile_context>

<pallas_src>
import functools

import jax
import jax.numpy as jnp
from jax import lax
from jax.experimental import pallas as pl
from jax.experimental.pallas import tpu as pltpu


# 3x3 taps in (dy, dx) order; tap index t = (dy+1)*3 + (dx+1) = ky*3 + kx.
_TAPS = tuple((dy, dx) for dy in (-1, 0, 1) for dx in (-1, 0, 1))


def _aster_block_kernel(x_ref, w1_ref, w2_ref, bias_ref, mask_ref, o_ref, *,
                        W, precision):
    """One batch block (bblk images packed along the lane axis).

    x_ref    : (Cin, L)            input, L = bblk * H * W lanes
    w1_ref   : (planes, Cin)       conv1x1 weight, BN1 scale pre-folded
    w2_ref   : (planes, 9*planes)  conv3x3 weight, tap-major K, BN2 scale folded
    bias_ref : (planes, 2)         [:, 0] = folded BN1 bias, [:, 1] = BN2 bias
    mask_ref : (9, 1, L)           per-tap zero-padding validity masks
    o_ref    : (planes, L)         output
    """
    L = x_ref.shape[-1]
    mm_dtype = w1_ref.dtype
    b1 = bias_ref[:, 0:1]
    b2 = bias_ref[:, 1:2]

    # conv1x1 (+ folded BN1 scale) -> bias -> ReLU.  Accumulate in f32.
    y1 = jnp.dot(w1_ref[...], x_ref[...].astype(mm_dtype),
                 preferred_element_type=jnp.float32, precision=precision)
    y1 = jnp.maximum(y1 + b1, 0.0)

    # conv3x3 (padding=1): tap (dy, dx) reads y1[:, h+dy, w+dx], realized as a
    # lane roll by -(dy*W + dx) with out-of-bounds (and cross-image) positions
    # zeroed by the precomputed masks.  All 9 taps are stacked along the
    # contraction axis so the MXU itself accumulates the tap sum.
    pieces = []
    for t, (dy, dx) in enumerate(_TAPS):
        s = dy * W + dx
        if s == 0:
            pieces.append(y1)
        else:
            pieces.append(pltpu.roll(y1, (-s) % L, 1) * mask_ref[t])
    stacked = jnp.concatenate(pieces, axis=0).astype(mm_dtype)   # (9*planes, L)

    y2 = jnp.dot(w2_ref[...], stacked,
                 preferred_element_type=jnp.float32, precision=precision) + b2

    # Identity residual + ReLU.  Re-read x here: cheap vld, short live range.
    out = jnp.maximum(y2 + x_ref[...].astype(jnp.float32), 0.0)
    o_ref[...] = out.astype(o_ref.dtype)


def _pick_batch_block(B, HW, planes, itemsize, target_bytes=4 << 20):
    """Largest batch block whose x slab stays under `target_bytes`, keeping
    >= 2 grid steps when B allows it (so both v7x TensorCores get work)."""
    divisors = [d for d in range(1, B + 1) if B % d == 0]
    fits = [d for d in divisors if d * HW * planes * itemsize <= target_bytes]
    if not fits:
        fits = [1]
    two_step = [d for d in fits if B // d >= 2]
    return max(two_step) if two_step else max(fits)


def aster_block(x, conv1_w, conv2_w, bn1_params, bn2_params, *, eps=1e-5,
                stride=1, downsample=None, matmul_dtype=None):
    """Pallas TPU forward of AsterBlock (inference-mode BatchNorm).

    x          : (B, Cin, H, W)
    conv1_w    : (planes, Cin, 1, 1)
    conv2_w    : (planes, planes, 3, 3)
    bn?_params : (gamma, beta, running_mean, running_var), each (planes,)
    """
    if stride != 1 or downsample is not None:
        # TODO(synk): stride != 1 and the downsample branch are not implemented
        # (module defaults are stride=1, downsample=None -> identity residual).
        raise NotImplementedError("stride != 1 / downsample not supported")

    B, Cin, H, W = x.shape
    planes = conv1_w.shape[0]
    assert conv1_w.shape == (planes, Cin, 1, 1)
    assert conv2_w.shape == (planes, planes, 3, 3)
    assert Cin == planes, "identity residual requires inplanes == planes"
    HW = H * W
    assert HW % 128 == 0, "H*W must be a multiple of 128 (lane-dense layout)"

    mm_dtype = jnp.dtype(jnp.float32 if matmul_dtype is None else matmul_dtype)
    # Match the reference conv precision when operands stay f32.
    precision = (lax.Precision.HIGHEST if mm_dtype == jnp.float32
                 else lax.Precision.DEFAULT)

    # ---- Batch-invariant precomputation, hoisted to the wrapper ----
    def fold_bn(params):
        g, b, m, v = (jnp.asarray(p, jnp.float32) for p in params)
        inv = g * lax.rsqrt(v + eps)
        return inv, b - m * inv

    s1, b1 = fold_bn(bn1_params)
    s2, b2 = fold_bn(bn2_params)

    # Fold the BN scales straight into the conv weights.
    w1_flat = (conv1_w.reshape(planes, Cin).astype(jnp.float32)
               * s1[:, None]).astype(mm_dtype)
    # (planes, planes, 3, 3) -> [ky, kx, o, i] -> [o, t, i] -> (planes, 9*planes)
    w2 = jnp.transpose(conv2_w, (2, 3, 0, 1)).astype(jnp.float32)
    w2 = w2 * s2[None, None, :, None]
    w2_flat = (jnp.transpose(w2.reshape(9, planes, planes), (1, 0, 2))
               .reshape(planes, 9 * planes)).astype(mm_dtype)
    bias = jnp.stack([b1, b2], axis=1)                          # (planes, 2)

    # Batch packing along the lane axis.
    bblk = _pick_batch_block(B, HW, planes, x.dtype.itemsize)
    nsteps = B // bblk
    L = bblk * HW

    # Per-tap validity masks over the flattened per-image spatial index,
    # tiled across the bblk images packed into one lane axis.
    idx = jnp.arange(HW, dtype=jnp.int32)
    hh, ww = idx // W, idx % W
    masks = [((hh + dy >= 0) & (hh + dy < H) & (ww + dx >= 0) & (ww + dx < W))
             for dy, dx in _TAPS]
    mask_img = jnp.stack(masks, axis=0).astype(jnp.float32)     # (9, HW)
    mask = jnp.tile(mask_img, (1, bblk)).reshape(9, 1, L)

    # (B, Cin, H, W) -> (Cin, B*H*W): channels on sublanes, batch*space on lanes.
    x_packed = jnp.transpose(x, (1, 0, 2, 3)).reshape(Cin, B * HW)

    kernel = functools.partial(_aster_block_kernel, W=W, precision=precision)
    const2 = lambda i: (0, 0)
    const3 = lambda i: (0, 0, 0)

    # NOTE: at production planes/HW, additionally single-buffer the constant
    # weight/mask operands (pipeline_mode=pl.Buffered(1)) and tile H into row
    # blocks with a 1-row halo to bound the VMEM slab on v7x (64 MiB).
    out = pl.pallas_call(
        kernel,
        out_shape=jax.ShapeDtypeStruct((planes, B * HW), x.dtype),
        grid_spec=pltpu.PrefetchScalarGridSpec(
            num_scalar_prefetch=0,
            grid=(nsteps,),
            in_specs=[
                pl.BlockSpec((Cin, L), lambda i: (0, i)),         # x (packed)
                pl.BlockSpec((planes, Cin), const2),              # w1 (s1 folded)
                pl.BlockSpec((planes, 9 * planes), const2),       # w2 (s2 folded)
                pl.BlockSpec((planes, 2), const2),                # [b1 | b2]
                pl.BlockSpec((9, 1, L), const3),                  # tap masks
            ],
            out_specs=pl.BlockSpec((planes, L), lambda i: (0, i)),
        ),
        compiler_params=pltpu.CompilerParams(
            dimension_semantics=("parallel",),
        ),
    )(x_packed, w1_flat, w2_flat, bias, mask)

    return out.reshape(planes, B, H, W).transpose(1, 0, 2, 3)


# ---------------- pure-JAX reference ----------------
def _reference(x, conv1_w, conv2_w, bn1_params, bn2_params, eps=1e-5):
    def bn(y, params):
        g, b, m, v = params
        inv = g / jnp.sqrt(v + eps)
        return y * inv[None, :, None, None] + (b - m * inv)[None, :, None, None]

    dn = ("NCHW", "OIHW", "NCHW")
    y = lax.conv_general_dilated(x, conv1_w, (1, 1), "VALID",
                                 dimension_numbers=dn,
                                 precision=lax.Precision.HIGHEST)
    y = jnp.maximum(bn(y, bn1_params), 0.0)
    y = lax.conv_general_dilated(y, conv2_w, (1, 1), ((1, 1), (1, 1)),
                                 dimension_numbers=dn,
                                 precision=lax.Precision.HIGHEST)
    y = bn(y, bn2_params) + x
    return jnp.maximum(y, 0.0)


if __name__ == "__main__":
    key = jax.random.PRNGKey(0)
    B, C, H, W = 2, 8, 16, 16
    planes = C

    keys = jax.random.split(key, 11)
    x = jax.random.normal(keys[0], (B, C, H, W), dtype=jnp.float32)
    conv1_w = jax.random.normal(keys[1], (planes, C, 1, 1), dtype=jnp.float32) * 0.5
    conv2_w = jax.random.normal(keys[2], (planes, planes, 3, 3), dtype=jnp.float32) * 0.2

    bn1 = (1.0 + 0.1 * jax.random.normal(keys[3], (planes,), dtype=jnp.float32),   # gamma
           0.1 * jax.random.normal(keys[4], (planes,), dtype=jnp.float32),         # beta
           0.1 * jax.random.normal(keys[5], (planes,), dtype=jnp.float32),         # mean
           0.5 + jax.nn.softplus(jax.random.normal(keys[6], (planes,), dtype=jnp.float32)))  # var
    bn2 = (1.0 + 0.1 * jax.random.normal(keys[7], (planes,), dtype=jnp.float32),
           0.1 * jax.random.normal(keys[8], (planes,), dtype=jnp.float32),
           0.1 * jax.random.normal(keys[9], (planes,), dtype=jnp.float32),
           0.5 + jax.nn.softplus(jax.random.normal(keys[10], (planes,), dtype=jnp.float32)))

    out = aster_block(x, conv1_w, conv2_w, bn1, bn2)
    out = jax.block_until_ready(out)

    ref = _reference(x, conv1_w, conv2_w, bn1, bn2)
    assert out.shape == (B, planes, H, W), out.shape
    max_err = float(jnp.max(jnp.abs(out - ref)))
    assert jnp.allclose(out, ref, atol=1e-3, rtol=1e-3), f"mismatch, max_err={max_err}"

    print("KERNEL_OK")
</pallas_src>

<mosaic_0001>
module attributes {stable_mosaic.version = 11 : i64} {
  func.func @_aster_block_kernel(%arg0: i32, %arg1: memref<8x256xf32, #tpu.memory_space<vmem>>, %arg2: memref<8x8xf32, #tpu.memory_space<vmem>>, %arg3: memref<8x72xf32, #tpu.memory_space<vmem>>, %arg4: memref<8x2xf32, #tpu.memory_space<vmem>>, %arg5: memref<9x1x256xf32, #tpu.memory_space<vmem>>, %arg6: memref<8x256xf32, #tpu.memory_space<vmem>>) attributes {dimension_semantics = [#tpu.dimension_semantics<parallel>], iteration_bounds = array<i64: 2>, scalar_prefetch = 0 : i64, scratch_operands = 0 : i64, tpu.core_type = #tpu.core_type<tc>, window_params = [{transform_indices = @transform_0, window_bounds = array<i64: 8, 256>}, {pipeline_mode = #tpu.pipeline_mode<synchronous>, transform_indices = @transform_1, window_bounds = array<i64: 8, 8>}, {pipeline_mode = #tpu.pipeline_mode<synchronous>, transform_indices = @transform_2, window_bounds = array<i64: 8, 72>}, {pipeline_mode = #tpu.pipeline_mode<synchronous>, transform_indices = @transform_3, window_bounds = array<i64: 8, 2>}, {pipeline_mode = #tpu.pipeline_mode<synchronous>, transform_indices = @transform_4, window_bounds = array<i64: 9, 1, 256>}, {transform_indices = @transform_5, window_bounds = array<i64: 8, 256>}]} {
    %c0 = arith.constant 0 : index
    %c0_0 = arith.constant 0 : index
    %0 = vector.load %arg4[%c0, %c0_0] : memref<8x2xf32, #tpu.memory_space<vmem>>, vector<8x1xf32>
    %c0_1 = arith.constant 0 : index
    %c1 = arith.constant 1 : index
    %1 = vector.load %arg4[%c0_1, %c1] : memref<8x2xf32, #tpu.memory_space<vmem>>, vector<8x1xf32>
    %c0_2 = arith.constant 0 : index
    %c0_3 = arith.constant 0 : index
    %2 = vector.load %arg2[%c0_2, %c0_3] : memref<8x8xf32, #tpu.memory_space<vmem>>, vector<8x8xf32>
    %c0_4 = arith.constant 0 : index
    %c0_5 = arith.constant 0 : index
    %3 = vector.load %arg1[%c0_4, %c0_5] : memref<8x256xf32, #tpu.memory_space<vmem>>, vector<8x256xf32>
    %cst = arith.constant dense<0.000000e+00> : vector<8x256xf32>
    %4 = tpu.matmul %2, %3, %cst {dimension_numbers = #tpu.dot_dimension_numbers<[1], [0], [0], [1], [0, 0, 1, 1], [], []>, precision = #tpu.contract_precision<fp32>} : vector<8x8xf32>, vector<8x256xf32>, vector<8x256xf32> -> vector<8x256xf32>
    %5 = vector.broadcast %0 : vector<8x1xf32> to vector<8x256xf32>
    %6 = arith.addf %4, %5 : vector<8x256xf32>
    %cst_6 = arith.constant 0.000000e+00 : f32
    %7 = vector.broadcast %cst_6 : f32 to vector<8x256xf32>
    %8 = arith.maximumf %6, %7 : vector<8x256xf32>
    %c17_i32 = arith.constant 17 : i32
    %9 = tpu.dynamic_rotate %8 by %c17_i32 dim 1 : vector<8x256xf32>, i32 -> vector<8x256xf32>
    %c0_7 = arith.constant 0 : index
    %c0_8 = arith.constant 0 : index
    %c0_9 = arith.constant 0 : index
    %10 = vector.load %arg5[%c0_7, %c0_8, %c0_9] : memref<9x1x256xf32, #tpu.memory_space<vmem>>, vector<1x1x256xf32>
    %11 = vector.shape_cast %10 : vector<1x1x256xf32> to vector<1x256xf32>
    %12 = vector.broadcast %11 : vector<1x256xf32> to vector<8x256xf32>
    %13 = arith.mulf %9, %12 : vector<8x256xf32>
    %c16_i32 = arith.constant 16 : i32
    %14 = tpu.dynamic_rotate %8 by %c16_i32 dim 1 : vector<8x256xf32>, i32 -> vector<8x256xf32>
    %c1_10 = arith.constant 1 : index
    %c0_11 = arith.constant 0 : index
    %c0_12 = arith.constant 0 : index
    %15 = vector.load %arg5[%c1_10, %c0_11, %c0_12] : memref<9x1x256xf32, #tpu.memory_space<vmem>>, vector<1x1x256xf32>
    %16 = vector.shape_cast %15 : vector<1x1x256xf32> to vector<1x256xf32>
    %17 = vector.broadcast %16 : vector<1x256xf32> to vector<8x256xf32>
    %18 = arith.mulf %14, %17 : vector<8x256xf32>
    %c15_i32 = arith.constant 15 : i32
    %19 = tpu.dynamic_rotate %8 by %c15_i32 dim 1 : vector<8x256xf32>, i32 -> vector<8x256xf32>
    %c2 = arith.constant 2 : index
    %c0_13 = arith.constant 0 : index
    %c0_14 = arith.constant 0 : index
    %20 = vector.load %arg5[%c2, %c0_13, %c0_14] : memref<9x1x256xf32, #tpu.memory_space<vmem>>, vector<1x1x256xf32>
    %21 = vector.shape_cast %20 : vector<1x1x256xf32> to vector<1x256xf32>
    %22 = vector.broadcast %21 : vector<1x256xf32> to vector<8x256xf32>
    %23 = arith.mulf %19, %22 : vector<8x256xf32>
    %c1_i32 = arith.constant 1 : i32
    %24 = tpu.dynamic_rotate %8 by %c1_i32 dim 1 : vector<8x256xf32>, i32 -> vector<8x256xf32>
    %c3 = arith.constant 3 : index
    %c0_15 = arith.constant 0 : index
    %c0_16 = arith.constant 0 : index
    %25 = vector.load %arg5[%c3, %c0_15, %c0_16] : memref<9x1x256xf32, #tpu.memory_space<vmem>>, vector<1x1x256xf32>
    %26 = vector.shape_cast %25 : vector<1x1x256xf32> to vector<1x256xf32>
    %27 = vector.broadcast %26 : vector<1x256xf32> to vector<8x256xf32>
    %28 = arith.mulf %24, %27 : vector<8x256xf32>
    %c255_i32 = arith.constant 255 : i32
    %29 = tpu.dynamic_rotate %8 by %c255_i32 dim 1 : vector<8x256xf32>, i32 -> vector<8x256xf32>
    %c5 = arith.constant 5 : index
    %c0_17 = arith.constant 0 : index
    %c0_18 = arith.constant 0 : index
    %30 = vector.load %arg5[%c5, %c0_17, %c0_18] : memref<9x1x256xf32, #tpu.memory_space<vmem>>, vector<1x1x256xf32>
    %31 = vector.shape_cast %30 : vector<1x1x256xf32> to vector<1x256xf32>
    %32 = vector.broadcast %31 : vector<1x256xf32> to vector<8x256xf32>
    %33 = arith.mulf %29, %32 : vector<8x256xf32>
    %c241_i32 = arith.constant 241 : i32
    %34 = tpu.dynamic_rotate %8 by %c241_i32 dim 1 : vector<8x256xf32>, i32 -> vector<8x256xf32>
    %c6 = arith.constant 6 : index
    %c0_19 = arith.constant 0 : index
    %c0_20 = arith.constant 0 : index
    %35 = vector.load %arg5[%c6, %c0_19, %c0_20] : memref<9x1x256xf32, #tpu.memory_space<vmem>>, vector<1x1x256xf32>
    %36 = vector.shape_cast %35 : vector<1x1x256xf32> to vector<1x256xf32>
    %37 = vector.broadcast %36 : vector<1x256xf32> to vector<8x256xf32>
    %38 = arith.mulf %34, %37 : vector<8x256xf32>
    %c240_i32 = arith.constant 240 : i32
    %39 = tpu.dynamic_rotate %8 by %c240_i32 dim 1 : vector<8x256xf32>, i32 -> vector<8x256xf32>
    %c7 = arith.constant 7 : index
    %c0_21 = arith.constant 0 : index
    %c0_22 = arith.constant 0 : index
    %40 = vector.load %arg5[%c7, %c0_21, %c0_22] : memref<9x1x256xf32, #tpu.memory_space<vmem>>, vector<1x1x256xf32>
    %41 = vector.shape_cast %40 : vector<1x1x256xf32> to vector<1x256xf32>
    %42 = vector.broadcast %41 : vector<1x256xf32> to vector<8x256xf32>
    %43 = arith.mulf %39, %42 : vector<8x256xf32>
    %c239_i32 = arith.constant 239 : i32
    %44 = tpu.dynamic_rotate %8 by %c239_i32 dim 1 : vector<8x256xf32>, i32 -> vector<8x256xf32>
    %c8 = arith.constant 8 : index
    %c0_23 = arith.constant 0 : index
    %c0_24 = arith.constant 0 : index
    %45 = vector.load %arg5[%c8, %c0_23, %c0_24] : memref<9x1x256xf32, #tpu.memory_space<vmem>>, vector<1x1x256xf32>
    %46 = vector.shape_cast %45 : vector<1x1x256xf32> to vector<1x256xf32>
    %47 = vector.broadcast %46 : vector<1x256xf32> to vector<8x256xf32>
    %48 = arith.mulf %44, %47 : vector<8x256xf32>
    %49 = tpu.concatenate %13, %18, %23, %28, %8, %33, %38, %43, %48 in 0 : vector<8x256xf32>, vector<8x256xf32>, vector<8x256xf32>, vector<8x256xf32>, vector<8x256xf32>, vector<8x256xf32>, vector<8x256xf32>, vector<8x256xf32>, vector<8x256xf32> -> vector<72x256xf32>
    %c0_25 = arith.constant 0 : index
    %c0_26 = arith.constant 0 : index
    %50 = vector.load %arg3[%c0_25, %c0_26] : memref<8x72xf32, #tpu.memory_space<vmem>>, vector<8x72xf32>
    %cst_27 = arith.constant dense<0.000000e+00> : vector<8x256xf32>
    %51 = tpu.matmul %50, %49, %cst_27 {dimension_numbers = #tpu.dot_dimension_numbers<[1], [0], [0], [1], [0, 0, 1, 1], [], []>, precision = #tpu.contract_precision<fp32>} : vector<8x72xf32>, vector<72x256xf32>, vector<8x256xf32> -> vector<8x256xf32>
    %52 = vector.broadcast %1 : vector<8x1xf32> to vector<8x256xf32>
    %53 = arith.addf %51, %52 : vector<8x256xf32>
    %c0_28 = arith.constant 0 : index
    %c0_29 = arith.constant 0 : index
    %54 = vector.load %arg1[%c0_28, %c0_29] : memref<8x256xf32, #tpu.memory_space<vmem>>, vector<8x256xf32>
    %55 = arith.addf %53, %54 : vector<8x256xf32>
    %cst_30 = arith.constant 0.000000e+00 : f32
    %56 = vector.broadcast %cst_30 : f32 to vector<8x256xf32>
    %57 = arith.maximumf %55, %56 : vector<8x256xf32>
    %c0_31 = arith.constant 0 : index
    %c0_32 = arith.constant 0 : index
    %58 = vector.load %arg6[%c0_31, %c0_32] : memref<8x256xf32, #tpu.memory_space<vmem>>, vector<8x256xf32>
    tpu.vector_store %arg6[%c0_31, %c0_32], %57 {strides = array<i32>} : memref<8x256xf32, #tpu.memory_space<vmem>>, vector<8x256xf32>,
    return
  }
  func.func @transform_0(%arg0: i32) -> (i32, i32) {
    %c0_i32 = arith.constant 0 : i32
    %c0_i32_0 = arith.constant 0 : i32
    return %c0_i32, %arg0 : i32, i32
  }
  func.func @transform_1(%arg0: i32) -> (i32, i32) {
    %c0_i32 = arith.constant 0 : i32
    %c0_i32_0 = arith.constant 0 : i32
    %c0_i32_1 = arith.constant 0 : i32
    return %c0_i32, %c0_i32_0 : i32, i32
  }
  func.func @transform_2(%arg0: i32) -> (i32, i32) {
    %c0_i32 = arith.constant 0 : i32
    %c0_i32_0 = arith.constant 0 : i32
    %c0_i32_1 = arith.constant 0 : i32
    return %c0_i32, %c0_i32_0 : i32, i32
  }
  func.func @transform_3(%arg0: i32) -> (i32, i32) {
    %c0_i32 = arith.constant 0 : i32
    %c0_i32_0 = arith.constant 0 : i32
    %c0_i32_1 = arith.constant 0 : i32
    return %c0_i32, %c0_i32_0 : i32, i32
  }
  func.func @transform_4(%arg0: i32) -> (i32, i32, i32) {
    %c0_i32 = arith.constant 0 : i32
    %c0_i32_0 = arith.constant 0 : i32
    %c0_i32_1 = arith.constant 0 : i32
    %c0_i32_2 = arith.constant 0 : i32
    return %c0_i32, %c0_i32_0, %c0_i32_1 : i32, i32, i32
  }
  func.func @transform_5(%arg0: i32) -> (i32, i32) {
    %c0_i32 = arith.constant 0 : i32
    %c0_i32_0 = arith.constant 0 : i32
    return %c0_i32, %arg0 : i32, i32
  }
}

</mosaic_0001>

<bundles_post_ra>
// kernel: tpu_custom_call.1
= control target key start
LH: loop header
LB: loop body
LE: loop exit
PB: predicated region body
PF: predicated region fallthrough
CT: control target
= control target key end

     0   :  { %10 = vsyncpa [#allocation3], 0  ;;  %s2770_s0 = inlined_call_operand.hbm [shape: f32[8,512], index: 0, kind: input, shape index: {}]   ;;  %s2771_s1 = inlined_call_operand.hbm [shape: f32[8,8], index: 1, kind: input, shape index: {}]   ;;  %s2772_s2 = inlined_call_operand.hbm [shape: f32[8,72], index: 2, kind: input, shape index: {}]   ;;  %s2773_s3 = inlined_call_operand.vmem [shape: f32[8,2], index: 3, kind: input, shape index: {}]   ;;  %s2774_s4 = inlined_call_operand.vmem [shape: f32[9,1,256], index: 4, kind: input, shape index: {}]   ;;  %s2775_s5 = inlined_call_operand.hbm [shape: f32[8,512], index: 5, kind: output, shape index: {}]  }
   0x1   :  { %12 = vsyncpa [#allocation3 + $0x1], 0 }
   0x2   :  { %13 = vsyncpa [#allocation6], 0 }
   0x3   :  { %14 = vsyncpa [#allocation4], 0 }
   0x4   :  { %16 = vsyncpa [#allocation4 + $0x1], 0  ;;  %s2148_s18 = smov 0   ;;  %s2150_s19 = smov 0  }
   0x5   :  { %s2152_s20 = smov 0   ;;  %s2154_s21 = smov 0  }
   0x6 LB: > { %s2169_s22 = sadd.s32 4294967295, %s2101_s21   ;;  %s1717_s23 = sadd.s32 4294967294, %s2101_s21   ;;  %s2101_s21 = sphi %s2154_s21, %s2805_s21   ;;  %s2097_s20 = sphi %s2152_s20, %s2804_s20   ;;  %s2093_s19 = sphi %s2150_s19, %s2803_s19   ;;  %s2089_s18 = sphi %s2148_s18, %s2802_s18  }
   0x7   : > { %p42_p0 = scmp.ne.s32.totalorder %s2093_s19, %s2089_s18  ;;  %p2776_p1 = scmp.eq.s32.totalorder %s2169_s22, 0 }
   0x8   : > { %p156_p3 = scmp.eq.s32.totalorder %s1717_s23, 1  ;;  %p1718_p5 = scmp.ge.s32.totalorder %s2101_s21, 1 }
   0x9   : > { %p2178_p4 = por %p2776_p1, %p42_p0  ;;  %p163_p7 = scmp.lt.s32.totalorder %s2101_s21, 3 }
   0xa   : > { %p2183_p6 = por %p156_p3, %p42_p0  ;;  %s2103_s27 = smov [#allocation5]  }
   0xb   : > { %s2784_s24 = scalar_select %p2178_p4, 1, 0 }
   0xc   : > { %s2785_s25 = scalar_select %p2183_p6, 1, 0 }
   0xd   : > { %p2188_p8 = pnand %p1718_p5, %p163_p7  ;;  %s176_s28 = sshll.u32 %s2103_s27, 4  ;;  %s177_s28 = int_to_ptr.vmem [resolvable:$true] %s176_s28 }
   0xe   : > { %s2104_s29 = smov [#allocation7]   ;;  %s2204_s7 = sadd.s32 1, %s2101_s21  }
   0xf   : > { %s2786_s26 = scalar_select %p2188_p8, 1, 0 }
  0x10   : > { %p1876_p10 = pneg %p2188_p8  ;;  %s187_s30 = sshll.u32 %s2104_s29, 4  ;;  %s2201_s30 = int_to_ptr.vmem [resolvable:$true] %s187_s30 }
  0x11   : > { %s26_s8 = ssub.s32 %s2101_s21, %s2204_s7  ;;  %s1945_s11 = scalar_lea.hbm %s2771_s1, 128 }
  0x12   : > { %p2197_p11 = pnand %p1876_p10, %p2776_p1  ;;  %p1946_p12 = scmp.ne.s32.totalorder %s2771_s1, %s1945_s11 }
  0x13   : > { %p1952_p5 = scmp.lt.u32.totalorder %s1945_s11, %s2771_s1 }
  0x14   : > { %p1947_p13 = pneg %p2197_p11 }
  0x16   : > { %p1948_p0 = pnand %p1947_p13, %p1946_p12 }
  0x18   : > { %p1949_p3 = pneg %p1948_p0 }
  0x1a   : > { %p1954_p7 = pnand %p1952_p5, %p1949_p3 }
  0x1c   : > { %1957 = shalt.err (!%p1954_p7)
}
  0x1d   : > { %s1958_s16 = scalar_lea.vmem %s177_s28, 128  ;;  %p1966_p2 = scmp.lt.s32.totalorder %s177_s28, %s177_s28 }
  0x1e   : > { %p1959_p10 = scmp.ne.s32.totalorder %s177_s28, %s1958_s16  ;;  %p1967_p6 = scmp.lt.s32.totalorder %s1958_s16, %s1958_s16 }
  0x20   : > { %p1961_p9 = pnand %p1959_p10, %p1947_p13  ;;  %p1968_p4 = por %p1967_p6, %p1966_p2 }
  0x22   : > { %p1962_p1 = pneg %p1961_p9 }
  0x24   : > { %p1969_p8 = pnand %p1968_p4, %p1962_p1 }
  0x26   : > { %1972 = shalt.err (!%p1969_p8)
}
  0x27   : > { %1879 = dma.hbm_to_vmem [thread:$0]  (!%p2197_p11), %s2771_s1, 128, %s177_s28, [#allocation6]  }
  0x28   : > { %s1973_s9 = scalar_lea.hbm %s2772_s2, 128 }
  0x29   : > { %p1974_p9 = scmp.ne.s32.totalorder %s2772_s2, %s1973_s9  ;;  %p1980_p4 = scmp.lt.u32.totalorder %s1973_s9, %s2772_s2 }
  0x2b   : > { %p1976_p2 = pnand %p1974_p9, %p1947_p13 }
  0x2d   : > { %p1977_p1 = pneg %p1976_p2 }
  0x2f   : > { %p1982_p6 = pnand %p1980_p4, %p1977_p1 }
  0x31   : > { %1985 = shalt.err (!%p1982_p6)
}
  0x32   : > { %s1986_s28 = scalar_lea.vmem %s2201_s30, 128  ;;  %p1994_p3 = scmp.lt.s32.totalorder %s2201_s30, %s2201_s30 }
  0x33   : > { %p1987_p8 = scmp.ne.s32.totalorder %s2201_s30, %s1986_s28  ;;  %p1995_p5 = scmp.lt.s32.totalorder %s1986_s28, %s1986_s28 }
  0x35   : > { %p1989_p12 = pnand %p1987_p8, %p1947_p13  ;;  %p1996_p7 = por %p1995_p5, %p1994_p3 }
  0x37   : > { %p1990_p0 = pneg %p1989_p12 }
  0x39   : > { %p1997_p10 = pnand %p1996_p7, %p1990_p0 }
  0x3b   : > { %2000 = shalt.err (!%p1997_p10)
}
  0x3c   : > { %1882 = dma.hbm_to_vmem [thread:$0]  (!%p2197_p11), %s2772_s2, 128, %s2201_s30, [#allocation6]  }
  0x3d   : > { %p27_p13 = scmp.eq.s32.totalorder %s26_s8, 0  ;;  %s29_s16 = sadd.s32 1, %s2097_s20 }
  0x3e   : > { %p36_p9 = scmp.ne.s32.totalorder %s2097_s20, %s2093_s19  ;;  %p37_p2 = scmp.eq.s32.totalorder %s2101_s21, 0 }
  0x3f   : > { %s2263_s6 = scalar_select %p27_p13, %s2097_s20, %s29_s16  }
  0x40   : > { %p38_p1 = por %p37_p2, %p36_p9  ;;  %p2788_p4 = scmp.eq.s32.totalorder %s2169_s22, 1 }
  0x41   : > { %p1893_p8 = scmp.lt.s32.totalorder %s2101_s21, 2  ;;  %s204_s23 = sand.u32 1, %s2097_s20  }
  0x42   : > { %p2267_p6 = por %p2788_p4, %p36_p9  ;;  %s1722_s27 = sshll.u32 %s204_s23, 4 }
  0x43   : > { %s1742_s29 = sshll.u32 %s2101_s21, 8  ;;  %s208_s8 = scalar_lea.vmem [#allocation2], %s1722_s27 }
  0x44   : > { %s2277_s30 = scalar_lea.hbm %s2770_s0, %s1742_s29  ;;  %s216_s11 = sshll.u32 %s208_s8, 4  ;;  %s2279_s11 = int_to_ptr.vmem [resolvable:$true] %s216_s11 }
  0x45   : > { %p2281_p11 = pnand %p1893_p8, %p38_p1  ;;  %s205_s13 = scalar_lea.sflag [#allocation3], %s204_s23 }
  0x46   : > { %s2001_s28 = scalar_lea.hbm %s2277_s30, 256  ;;  %s2006_s16 = scalar_lea.hbm %s2770_s0, 512 }
  0x47   : > { %p2002_p12 = scmp.ne.s32.totalorder %s2277_s30, %s2001_s28  ;;  %p2003_p0 = pneg %p2281_p11 }
  0x48   : > { %p2007_p7 = scmp.lt.u32.totalorder %s2277_s30, %s2770_s0  ;;  %p2008_p10 = scmp.lt.u32.totalorder %s2006_s16, %s2001_s28 }
  0x49   : > { %p2004_p3 = pnand %p2003_p0, %p2002_p12  ;;  %p2010_p9 = scmp.lt.u32.totalorder %s2001_s28, %s2277_s30 }
  0x4a   : > { %p2009_p13 = por %p2008_p10, %p2007_p7 }
  0x4b   : > { %p2005_p5 = pneg %p2004_p3 }
  0x4c   : > { %p2011_p2 = por %p2010_p9, %p2009_p13 }
  0x4e   : > { %p2012_p1 = pnand %p2011_p2, %p2005_p5 }
  0x50   : > { %2015 = shalt.err (!%p2012_p1)
}
  0x51   : > { %s2016_s23 = scalar_lea.vmem %s2279_s11, 256  ;;  %s2105_s9 = smov [#allocation2]  }
  0x52   : > { %p2017_p4 = scmp.ne.s32.totalorder %s2279_s11, %s2016_s23  ;;  %s2021_s10 = sshll.u32 %s2105_s9, 4  ;;  %s2022_s10 = int_to_ptr.vmem [resolvable:$false] %s2021_s10 }
  0x53   : > { %s2023_s8 = scalar_lea.vmem %s2022_s10, 512  ;;  %p2024_p3 = scmp.lt.s32.totalorder %s2279_s11, %s2022_s10 }
  0x54   : > { %p2019_p8 = pnand %p2017_p4, %p2003_p0  ;;  %p2025_p7 = scmp.lt.s32.totalorder %s2023_s8, %s2016_s23 }
  0x56   : > { %p2020_p12 = pneg %p2019_p8  ;;  %p2026_p10 = por %p2025_p7, %p2024_p3 }
  0x58   : > { %p2027_p13 = pnand %p2026_p10, %p2020_p12 }
  0x5a   : > { %2030 = shalt.err (!%p2027_p13)
}
  0x5b   : > { %1886 = dma.hbm_to_vmem [thread:$0]  (!%p2281_p11), %s2277_s30, 256, %s2279_s11, %s205_s13  }
  0x5c   : > { %p2791_p5 = scmp.ne.s32.totalorder %s2786_s26, 0 }
  0x5d   : > { %s2313_s28 = sand.u32 (!%p2791_p5), 1, %s2093_s19   ;;  %p2792_p0 = scmp.ne.s32.totalorder (!%p2791_p5), %s2784_s24, 0 }
  0x5e   : > { %225 = sbr.rel (%p2791_p5) target bundleno = 817 (0x331), region = 40  ;;  %s1726_s14 = sshll.u32 (!%p2791_p5), %s2313_s28, 4 }
  0x5f   : > { %s228_s15 = scalar_lea.sflag (!%p2791_p5), [#allocation3], %s2313_s28  ;;  %s231_s16 = scalar_lea.vmem (!%p2791_p5), [#allocation2], %s1726_s14 }
  0x65   : > { %2076 = dma.done.wait (%p2792_p0), %s228_s15, 256  }
  0x66   : > { %2078 = vsyncadd (%p2792_p0), %s228_s15, 4294967040  ;;  %p2793_p11 = scmp.eq.s32.totalorder %s2169_s22, 0 }
  0x68   : > { %2080 = dma.done.wait (%p2793_p11), [#allocation6], 256   ;;  %p2794_p9 = pmov %p2793_p11 }
  0x69   : > { %v2106_v0 = vmov 0.0   ;;  %v2107_v1 = vmov 0   ;;  %vm277_vm0 = vcmask 64512   ;;  %v2329_v2 = vld [vmem:[%s231_s16 + $0x8] sm:$0xff]  ;;  %v2331_v3 = vld [vmem:[%s231_s16] sm:$0xff]  ;;  %s2108_s30 = smov 16   ;;  %v752_v30 = vlaneseq }
  0x6a   : > { %2082 = vsyncadd (%p2794_p9), [#allocation6], 4294967040  ;;  %347 = vmatprep.mubr.f32.mxu0 %v2106_v0  ;;  %1942 = vset.pattern.permute.xlu0 %v2107_v1  ;;  %v269_v4 = vld [vmem:[#allocation5] sm:$0xff]  ;;  %v281_v5 = vand.u32 4294901760, %v2329_v2  ;;  %v283_v6 = vand.u32 4294901760, %v2331_v3  ;;  %s2109_s11 = smov 17  }
  0x6b   : > { %1290 = vmatprep.mubr.f32.mxu1 %v2106_v0  ;;  %v279_v7 = vsel %vm277_vm0, %v269_v4, 0  ;;  %v2338_v8 = vld [vmem:[%s2773_s3] sm:$0xff]  ;;  %s2110_s12 = smov 15   ;;  %s2111_s13 = smov 1   ;;  %v2116_v29 = vmov 1   ;;  %v760_v31 = vshrl.u32 %v752_v30, 7 }
  0x6c   : > { %v348_v9 = vand.u32 4294901760, %v279_v7  ;;  %274 = vperm.xlu0 %1942, %v2338_v8   ;;  %282 = vmatprep.subr.mxu0 %v281_v5  ;;  %v366_v10 = vsub.f32 %v2331_v3, %v283_v6  ;;  %v360_v11 = vsub.f32 %v2329_v2, %v281_v5  ;;  %s2112_s27 = smov 127   ;;  %s2113_s29 = smov 113   ;;  %v2370_v32 = vand.u32 127, %v752_v30  ;;  %v1730_v37 = vld [vmem:[%s2774_s4 + $0x2] sm:$0x3] }
  0x6d   : > { %284 = vmatpush1.msra.mxu0 %v283_v6  ;;  %s2114_s23 = smov 112   ;;  %s2115_s9 = smov 111   ;;  %1943 = vset.pattern.permute.xlu1 %v2116_v29  ;;  %v2372_v35 = vsub.s32 0, %v760_v31  ;;  %v2374_v36 = vsub.s32 1, %v760_v31  ;;  %v925_v39 = vld [vmem:[#allocation7] sm:$0xff]  ;;  %vm930_vm2 = vcmask 588800  }
  0x6e   : > { %v349_v12 = vsub.f32 %v279_v7, %v348_v9  ;;  %v361_v13 = vand.u32 4294901760, %v360_v11  ;;  %v367_v14 = vand.u32 4294901760, %v366_v10  ;;  %vm775_vm1 = vcmp.lt.s32.totalorder %v2370_v32, 16  ;;  %v1731_v40 = vld [vmem:[%s2774_s4 + $0x4] sm:$0x3]  ;;  %s1743_s15 = sshll.u32 %s2169_s22, 8 }
  0x6f   : > { %v784_v43 = vrot.slane %v1730_v37, %v2372_v35  ;;  %v757_v45 = vld [vmem:[%s2774_s4] sm:$0x3]  ;;  %v788_v46 = vrot.slane %v1730_v37, %v2374_v36  ;;  %v932_v48 = vsel %vm930_vm2, %v925_v39, 0  ;;  %vm797_vm3 = vcmp.lt.s32.totalorder %v2370_v32, 15  ;;  %v1732_v51 = vld [vmem:[%s2774_s4 + $0x6] sm:$0x3] }
  0x70   : > { %v350_v15 = vand.u32 4294901760, %v349_v12  ;;  %v362_v16 = vsub.f32 %v360_v11, %v361_v13  ;;  %v368_v17 = vsub.f32 %v366_v10, %v367_v14  ;;  %1944 = vset.pattern.permute.xlu0 %v2116_v29  ;;  %v806_v49 = vrot.slane %v1731_v40, %v2372_v35  ;;  %v2410_v55 = vld [vmem:[%s2774_s4 + $0xa] sm:$0x3]  ;;  %v2429_v4 = vld [vmem:[%s2774_s4 + $0xc] sm:$0x3]  ;;  %s265_s16 = scalar_lea.vmem [#allocation8], %s1726_s14 }
  0x71   : > { %v810_v50 = vrot.slane %v1731_v40, %v2374_v36  ;;  %vm754_vm4 = vcmp.lt.s32.totalorder %v2370_v32, 17  ;;  %v762_v54 = vrot.slane %v757_v45, %v2372_v35  ;;  %v766_v60 = vrot.slane %v757_v45, %v2374_v36  ;;  %s1628_s24 = sshll.u32 %s265_s16, 4  ;;  %s1614_s22 = scalar_lea.sflag [#allocation4], %s2313_s28  ;;  %s2728_s24 = int_to_ptr.vmem [resolvable:$true] %s1628_s24 }
  0x72   : > { %v351_v18 = vsub.f32 %v349_v12, %v350_v15  ;;  %v363_v19 = vand.u32 4294901760, %v362_v16  ;;  %v369_v20 = vand.u32 4294901760, %v368_v17  ;;  %vm819_vm5 = vcmp.lt.s32.totalorder %v2370_v32, 1  ;;  %s2117_s14 = smov [#allocation8]  }
  0x73   : > { %v2419_v61 = vand.u32 4294901760, %v932_v48  ;;  %v828_v63 = vrot.slane %v1732_v51, %v2372_v35  ;;  %v832_v1 = vrot.slane %v1732_v51, %v2374_v36  ;;  %vm841_vm6 = vcmp.lt.s32.totalorder %v2370_v32, 127 }
  0x74   : > { %v352_v21 = vand.u32 4294901760, %v351_v18  ;;  %364 = vmatprep.subr.mxu0 %v363_v19  ;;  %v854_v7 = vrot.slane %v2410_v55, %v2374_v36  ;;  %vm863_vm7 = vcmp.lt.s32.totalorder %v2370_v32, 113  ;;  %v876_v16 = vrot.slane %v2429_v4, %v2374_v36 }
  0x75   : > { %v2445_v17 = vsub.f32 %v932_v48, %v2419_v61  ;;  %vm885_vm8 = vcmp.lt.s32.totalorder %v2370_v32, 112  ;;  %vm907_vm9 = vcmp.lt.s32.totalorder %v2370_v32, 111 }
  0x76   : > { %353 = vmatmul.mubr.f32.vlgmr.msra.gmra.mrb[0].mxu0 %v352_v21 }
  0x77   : > { %370 = vmatpush1.msra.mxu0 %v369_v20  ;;  %433 = vmatprep.mubr.f32.mxu0 %v2106_v0 }
  0x78   : > { %443 = vmatprep.subr.mxu0 %v360_v11 }
  0x7e   : > { %435 = vmatmul.mubr.f32.vlgmr.msra.gmra.mrb[0].mxu0 %v348_v9 }
  0x7f   : > { %446 = vmatpush1.msra.mxu0 %v366_v10  ;;  %509 = vmatprep.mubr.f32.mxu0 %v2106_v0 }
  0x80   : > { %519 = vmatprep.subr.mxu0 %v281_v5 }
  0x86   : > { %512 = vmatmul.mubr.f32.vlgmr.msra.gmra.mrb[0].mxu0 %v349_v12 }
  0x87   : > { %521 = vmatpush1.msra.mxu0 %v283_v6  ;;  %584 = vmatprep.mubr.f32.mxu0 %v2106_v0 }
  0x88   : > { %597 = vmatprep.subr.mxu0 %v361_v13 }
  0x8e   : > { %588 = vmatmul.mubr.f32.vlgmr.msra.gmra.mrb[0].mxu0 %v350_v15  ;;  %v872_v15 = vrot.slane %v2429_v4, %v2372_v35 }
  0x8f   : > { %601 = vmatpush1.msra.mxu0 %v367_v14  ;;  %664 = vmatprep.mubr.f32.mxu0 %v2106_v0 }
  0x90   : > { %673 = vmatprep.subr.mxu0 %v281_v5 }
  0x96   : > { %666 = vmatmul.mubr.f32.vlgmr.msra.gmra.mrb[0].mxu0 %v348_v9 }
  0x97   : > { %675 = vmatpush1.msra.mxu0 %v283_v6  ;;  %738 = vmatprep.mubr.f32.mxu0 %v2106_v0  ;;  %v850_v6 = vrot.slane %v2410_v55, %v2372_v35 }
  0x9e   : > { %740 = vmatmul.mubr.f32.vlgmr.msra.gmra.mrb[0].mxu0 %v348_v9 }
  0x9f   : > { %1016 = vmatprep.mubr.f32.mxu0 %v2106_v0 }
  0xeb   : > { %v275_v22 = vpop.permute.xlu0 %274 }
 0x171   : > { %v741_v23 = vpop.f32.mrb[0].mxu0 }
 0x172   : > { %v1840_v24 = vadd.f32 %v741_v23, %v275_v22  ;;  %v743_v25 = vpop.f32.mrb[1].mxu0  ;;  %v2463_v23 = vld [vmem:[%s2774_s4 + $0x10] sm:$0x3] }
 0x173   : > { %v1841_v27 = vadd.f32 %v743_v25, %v275_v22  ;;  %v2458_v22 = vld [vmem:[%s2774_s4 + $0xe] sm:$0x3]  ;;  %v920_v51 = vrot.slane %v2463_v23, %v2374_v36 }
 0x174   : > { %v2349_v26 = vmax.f32 %v1840_v24, 0.0  ;;  %v894_v40 = vrot.slane %v2458_v22, %v2372_v35 }
 0x175   : > { %v2353_v28 = vmax.f32 %v1841_v27, 0.0 }
 0x176   : > { %771 = vrot.lane.b32.xlu1 %v2349_v26, %s2108_s30  ;;  %748 = vrot.lane.b32.xlu0 %v2349_v26, %s2109_s11  ;;  %v952_v38 = vand.u32 4294901760, %v2349_v26 }
 0x177   : > { %v950_v41 = vand.u32 4294901760, %v2353_v28 }
 0x178   : > { %v2401_v52 = vsub.f32 %v2349_v26, %v952_v38 }
 0x179   : > { %v2415_v56 = vsub.f32 %v2353_v28, %v950_v41 }
 0x17a   : > { %793 = vrot.lane.b32.xlu1 %v2349_v26, %s2110_s12  ;;  %773 = vrot.lane.b32.xlu0 %v2353_v28, %s2108_s30 }
 0x17b   : > { %v2781_v11 = vand.u32 4294901760, %v2415_v56 }
 0x17e   : > { %815 = vrot.lane.b32.xlu1 %v2349_v26, %s2111_s13  ;;  %795 = vrot.lane.b32.xlu0 %v2353_v28, %s2110_s12  ;;  %s2031_s12 = scalar_lea.vmem %s2728_s24, 256 }
 0x17f   : > { %p2032_p2 = scmp.ne.s32.totalorder %s2728_s24, %s2031_s12 }
 0x181   : > { %p2033_p1 = pnand %p2032_p2, %p2267_p6 }
 0x182   : > { %750 = vrot.lane.b32.xlu1 %v2353_v28, %s2109_s11  ;;  %817 = vrot.lane.b32.xlu0 %v2353_v28, %s2111_s13  ;;  %s2726_s11 = scalar_lea.hbm %s2775_s5, %s1743_s15  ;;  %s2035_s13 = sshll.u32 %s2117_s14, 4  ;;  %s2036_s13 = int_to_ptr.vmem [resolvable:$false] %s2035_s13 }
 0x183   : > { %p2034_p4 = pneg %p2033_p1  ;;  %p2038_p8 = scmp.lt.s32.totalorder %s2728_s24, %s2036_s13 }
 0x186   : > { %837 = vrot.lane.b32.xlu1 %v2349_v26, %s2112_s27  ;;  %839 = vrot.lane.b32.xlu0 %v2353_v28, %s2112_s27  ;;  %s2037_s27 = scalar_lea.vmem %s2036_s13, 512 }
 0x187   : > { %p2039_p12 = scmp.lt.s32.totalorder %s2037_s27, %s2031_s12 }
 0x189   : > { %p2040_p3 = por %p2039_p12, %p2038_p8 }
 0x18a   : > { %859 = vrot.lane.b32.xlu1 %v2349_v26, %s2113_s29  ;;  %861 = vrot.lane.b32.xlu0 %v2353_v28, %s2113_s29 }
 0x18b   : > { %p2041_p7 = pnand %p2040_p3, %p2034_p4 }
 0x18e   : > { %881 = vrot.lane.b32.xlu1 %v2349_v26, %s2114_s23  ;;  %883 = vrot.lane.b32.xlu0 %v2353_v28, %s2114_s23 }
 0x192   : > { %903 = vrot.lane.b32.xlu1 %v2349_v26, %s2115_s9  ;;  %905 = vrot.lane.b32.xlu0 %v2353_v28, %s2115_s9 }
 0x196   : > { %927 = vperm.xlu1 %1943, %v2338_v8   ;;  %v1084_v8 = vand.u32 4294901760, %v2401_v52 }
 0x1e8   : > { %v772_v33 = vpop.permute.xlu1 %771  ;;  %v749_v34 = vpop.permute.xlu0 %748 }
 0x1ec   : > { %v794_v42 = vpop.permute.xlu1 %793  ;;  %v774_v44 = vpop.permute.xlu0 %773 }
 0x1ed   : > { %v777_v47 = vsel %vm775_vm1, %v774_v44, %v772_v33  ;;  %v776_v53 = vsel %vm775_vm1, %v772_v33, %v774_v44 }
 0x1ee   : > { %v791_v57 = vmul.f32 %v784_v43, %v777_v47  ;;  %v792_v5 = vmul.f32 %v788_v46, %v776_v53  ;;  %v916_v43 = vrot.slane %v2463_v23, %v2372_v35  ;;  %v1019_v47 = vand.u32 4294901760, %v2445_v17 }
 0x1f0   : > { %v816_v58 = vpop.permute.xlu1 %815  ;;  %v796_v59 = vpop.permute.xlu0 %795  ;;  %v940_v12 = vand.u32 4294901760, %v791_v57  ;;  %v938_v24 = vand.u32 4294901760, %v792_v5 }
 0x1f1   : > { %v798_v62 = vsel %vm797_vm3, %v794_v42, %v796_v59  ;;  %v799_v9 = vsel %vm797_vm3, %v796_v59, %v794_v42  ;;  %v898_v42 = vrot.slane %v2458_v22, %v2374_v36 }
 0x1f2   : > { %v814_v10 = vmul.f32 %v810_v50, %v798_v62  ;;  %v813_v25 = vmul.f32 %v806_v49, %v799_v9  ;;  %v2472_v44 = vsub.f32 %v791_v57, %v940_v12  ;;  %v2479_v50 = vsub.f32 %v792_v5, %v938_v24 }
 0x1f4   : > { %v751_v13 = vpop.permute.xlu1 %750  ;;  %v818_v14 = vpop.permute.xlu0 %817  ;;  %v942_v29 = vand.u32 4294901760, %v814_v10  ;;  %v944_v53 = vand.u32 4294901760, %v813_v25  ;;  %v1048_v4 = vand.u32 4294901760, %v2472_v44 }
 0x1f5   : > { %v755_v18 = vsel %vm754_vm4, %v749_v34, %v751_v13  ;;  %v756_v19 = vsel %vm754_vm4, %v751_v13, %v749_v34  ;;  %v820_v20 = vsel %vm819_vm5, %v816_v58, %v818_v14  ;;  %v821_v21 = vsel %vm819_vm5, %v818_v14, %v816_v58 }
 0x1f6   : > { %v769_v27 = vmul.f32 %v762_v54, %v756_v19  ;;  %v770_v30 = vmul.f32 %v766_v60, %v755_v18  ;;  %v835_v31 = vmul.f32 %v828_v63, %v821_v21  ;;  %v836_v33 = vmul.f32 %v832_v1, %v820_v20 }
 0x1f7   : > { %v2484_v54 = vsub.f32 %v814_v10, %v942_v29  ;;  %v2500_v10 = vsub.f32 %v2445_v17, %v1019_v47  ;;  %v1042_v13 = vand.u32 4294901760, %v2479_v50  ;;  %v2506_v14 = vsub.f32 %v813_v25, %v944_v53 }
 0x1f8   : > { %v936_v34 = vand.u32 4294901760, %v769_v27  ;;  %v838_v37 = vpop.permute.xlu1 %837  ;;  %v840_v39 = vpop.permute.xlu0 %839  ;;  %v934_v45 = vand.u32 4294901760, %v770_v30  ;;  %v946_v48 = vand.u32 4294901760, %v836_v33  ;;  %v948_v57 = vand.u32 4294901760, %v835_v31 }
 0x1f9   : > { %v842_v46 = vsel %vm841_vm6, %v838_v37, %v840_v39  ;;  %v843_v49 = vsel %vm841_vm6, %v840_v39, %v838_v37  ;;  %v1054_v20 = vand.u32 4294901760, %v2484_v54  ;;  %v1043_v36 = vsub.f32 %v2479_v50, %v1042_v13 }
 0x1fa   : > { %v2486_v55 = vpack.c.bf16 %v940_v12, %v936_v34  ;;  %v2488_v58 = vsub.f32 %v769_v27, %v936_v34  ;;  %v857_v59 = vmul.f32 %v850_v6, %v842_v46  ;;  %v858_v60 = vmul.f32 %v854_v7, %v843_v49 }
 0x1fb   : > { %v2490_v63 = vpack.c.bf16 %v938_v24, %v934_v45  ;;  %v2503_v7 = vpack.c.bf16 %v946_v48, %v942_v29  ;;  %v2508_v18 = vsub.f32 %v836_v33, %v946_v48  ;;  %v2511_v19 = vsub.f32 %v770_v30, %v934_v45 }
 0x1fc   : > { %v860_v62 = vpop.permute.xlu1 %859  ;;  %v862_v1 = vpop.permute.xlu0 %861  ;;  %v954_v12 = vand.u32 4294901760, %v858_v60  ;;  %v2514_v21 = vsub.f32 %v835_v31, %v948_v57  ;;  %v956_v22 = vand.u32 4294901760, %v857_v59  ;;  %v2519_v29 = vpack.c.bf16 %v948_v57, %v944_v53 }
 0x1fd   : > { %v864_v5 = vsel %vm863_vm7, %v860_v62, %v862_v1  ;;  %v865_v9 = vsel %vm863_vm7, %v862_v1, %v860_v62  ;;  %1745 = vmatprep.subr.bf16.mxu0 %v2490_v63  ;;  %v1776_v30 = vpack.c.bf16 %v2479_v50, %v2511_v19  ;;  %v1036_v31 = vand.u32 4294901760, %v2488_v58 }
 0x1fe   : > { %v880_v6 = vmul.f32 %v876_v16, %v865_v9  ;;  %1747 = vmatpush1.bf16.msra.mxu0 %v2486_v55  ;;  %v879_v24 = vmul.f32 %v872_v15, %v864_v5  ;;  %v1778_v16 = vpack.c.bf16 %v2472_v44, %v2488_v58  ;;  %v2526_v37 = vsub.f32 %v858_v60, %v954_v12 }
 0x1ff   : > { %1749 = vmatprep.subr.bf16.mxu0 %v2503_v7  ;;  %1777 = vmatprep.subr.bf16.mxu1 %v1776_v30  ;;  %v1780_v45 = vpack.c.bf16 %v2508_v18, %v2484_v54  ;;  %v2535_v48 = vpack.c.bf16 %v954_v12, %v950_v41  ;;  %v1030_v49 = vand.u32 4294901760, %v2511_v19  ;;  %v2779_v53 = vand.u32 4294901760, %v2514_v21 }
 0x200   : > { %v882_v27 = vpop.permute.xlu1 %881  ;;  %v884_v25 = vpop.permute.xlu0 %883  ;;  %v958_v33 = vand.u32 4294901760, %v880_v6  ;;  %v2541_v57 = vpack.c.bf16 %v956_v22, %v952_v38  ;;  %1779 = vmatpush1.bf16.msra.mxu1 %v1778_v16  ;;  %v1782_v26 = vpack.c.bf16 %v2514_v21, %v2506_v14  ;;  %v1784_v38 = vpack.c.bf16 %v2526_v37, %v2415_v56 }
 0x201   : > { %v886_v34 = vsel %vm885_vm8, %v882_v27, %v884_v25  ;;  %v887_v15 = vsel %vm885_vm8, %v884_v25, %v882_v27  ;;  %1781 = vmatprep.subr.bf16.mxu1 %v1780_v45  ;;  %v1031_v16 = vsub.f32 %v2511_v19, %v1030_v49  ;;  %v1049_v27 = vsub.f32 %v2472_v44, %v1048_v4 }
 0x202   : > { %v901_v39 = vmul.f32 %v894_v40, %v886_v34  ;;  %v902_v46 = vmul.f32 %v898_v42, %v887_v15  ;;  %1751 = vmatpush1.bf16.msra.mxu0 %v2519_v29  ;;  %v960_v40 = vand.u32 4294901760, %v879_v24  ;;  %v2543_v42 = vsub.f32 %v857_v59, %v956_v22 }
 0x203   : > { %v2545_v5 = vsub.f32 %v880_v6, %v958_v33  ;;  %1753 = vmatprep.subr.bf16.mxu0 %v2535_v48  ;;  %v1037_v32 = vsub.f32 %v2488_v58, %v1036_v31  ;;  %v1032_v45 = vand.u32 4294901760, %v1031_v16  ;;  %v1073_v35 = vsub.f32 %v2514_v21, %v2779_v53 }
 0x204   : > { %v964_v60 = vand.u32 4294901760, %v901_v39  ;;  %v904_v62 = vpop.permute.xlu1 %903  ;;  %v906_v1 = vpop.permute.xlu0 %905  ;;  %v962_v28 = vand.u32 4294901760, %v902_v46  ;;  %1783 = vmatpush1.bf16.msra.mxu1 %v1782_v26  ;;  %v2589_v15 = vsub.f32 %v879_v24, %v960_v40  ;;  %v2782_v23 = vand.u32 4294901760, %v2543_v42 }
 0x205   : > { %v909_v41 = vsel %vm907_vm9, %v906_v1, %v904_v62  ;;  %v908_v59 = vsel %vm907_vm9, %v904_v62, %v906_v1  ;;  %1785 = vmatprep.subr.bf16.mxu1 %v1784_v38  ;;  %v1055_v24 = vsub.f32 %v2484_v54, %v1054_v20  ;;  %v1038_v62 = vand.u32 4294901760, %v1037_v32 }
 0x206   : > { %v2550_v9 = vpack.c.bf16 %v964_v60, %v960_v40  ;;  %v2558_v12 = vsub.f32 %v902_v46, %v962_v28  ;;  %v924_v6 = vmul.f32 %v920_v51, %v909_v41  ;;  %1755 = vmatpush1.bf16.msra.mxu0 %v2541_v57  ;;  %v2564_v22 = vpack.c.bf16 %v962_v28, %v958_v33 }
 0x207   : > { %v2575_v25 = vsub.f32 %v901_v39, %v964_v60  ;;  %v2783_v51 = vand.u32 4294901760, %v2506_v14  ;;  %v923_v33 = vmul.f32 %v916_v43, %v908_v59  ;;  %v1786_v39 = vpack.c.bf16 %v2543_v42, %v2401_v52 }
 0x208   : > { %v2584_v30 = vand.u32 4294901760, %v924_v6  ;;  %1757 = vmatprep.subr.bf16.mxu0 %v2564_v22  ;;  %v1788_v34 = vpack.c.bf16 %v2558_v12, %v2545_v5  ;;  %v1066_v46 = vand.u32 4294901760, %v2508_v18  ;;  %v1021_v43 = vand.u32 4294901760, %v2500_v10 }
 0x209   : > { %1787 = vmatpush1.bf16.msra.mxu1 %v1786_v39  ;;  %v1790_v40 = vpack.c.bf16 %v2575_v25, %v2589_v15  ;;  %v1044_v60 = vand.u32 4294901760, %v1043_v36  ;;  %v2609_v28 = vand.u32 4294901760, %v923_v33  ;;  %v2780_v41 = vand.u32 4294901760, %v2526_v37 }
 0x20a   : > { %1759 = vmatpush1.bf16.msra.mxu0 %v2550_v9  ;;  %v1067_v1 = vsub.f32 %v2508_v18, %v1066_v46  ;;  %1789 = vmatprep.subr.bf16.mxu1 %v1788_v34  ;;  %v2612_v10 = vsub.f32 %v924_v6, %v2584_v30  ;;  %v1114_v26 = vand.u32 4294901760, %v2558_v12  ;;  %v1061_v38 = vsub.f32 %v2506_v14, %v2783_v51 }
 0x20b   : > { %967 = vmatprep.subr.mxu0 %v2584_v30  ;;  %v1760_v59 = vpack.c.bf16 %v1044_v60, %v1032_v45  ;;  %v1050_v16 = vand.u32 4294901760, %v1049_v27  ;;  %v1056_v36 = vand.u32 4294901760, %v1055_v24  ;;  %v1079_v34 = vsub.f32 %v2415_v56, %v2781_v11 }
 0x20c   : > { %v1068_v32 = vand.u32 4294901760, %v1067_v1  ;;  %v1091_v6 = vsub.f32 %v2526_v37, %v2780_v41  ;;  %v1102_v39 = vand.u32 4294901760, %v2545_v5  ;;  %v1097_v53 = vsub.f32 %v2543_v42, %v2782_v23 }
 0x20d   : > { %v1120_v27 = vand.u32 4294901760, %v2575_v25  ;;  %1791 = vmatpush1.bf16.msra.mxu1 %v1790_v40  ;;  %v1762_v45 = vpack.c.bf16 %v1050_v16, %v1038_v62  ;;  %v1074_v24 = vand.u32 4294901760, %v1073_v35  ;;  %v1115_v41 = vsub.f32 %v2558_v12, %v1114_v26 }
 0x20e   : > { %969 = vmatpush1.msra.mxu0 %v2609_v28  ;;  %1240 = vmatprep.subr.mxu1 %v2612_v10  ;;  %v1764_v60 = vpack.c.bf16 %v1068_v32, %v1056_v36  ;;  %v1092_v1 = vand.u32 4294901760, %v1091_v6  ;;  %v1108_v11 = vand.u32 4294901760, %v2589_v15  ;;  %v2637_v23 = vsub.f32 %v923_v33, %v2609_v28 }
 0x20f   : > { %1761 = vmatprep.subr.bf16.mxu0 %v1760_v59  ;;  %1022 = vmatmul.mubr.f32.vlgmr.msra.gmra.mrb[2].mxu0 %v1021_v43  ;;  %v1062_v51 = vand.u32 4294901760, %v1061_v38  ;;  %v1085_v35 = vsub.f32 %v2401_v52, %v1084_v8  ;;  %v1080_v43 = vand.u32 4294901760, %v1079_v34  ;;  %v1103_v40 = vsub.f32 %v2545_v5, %v1102_v39 }
 0x210   : > { %1763 = vmatpush1.bf16.msra.mxu0 %v1762_v45  ;;  %1182 = vmatprep.mubr.f32.mxu0 %v2106_v0  ;;  %v1121_v62 = vsub.f32 %v2575_v25, %v1120_v27  ;;  %v1098_v38 = vand.u32 4294901760, %v1097_v53  ;;  %v1116_v16 = vand.u32 4294901760, %v1115_v41  ;;  %v1126_v32 = vand.u32 4294901760, %v2612_v10 }
 0x211   : > { %1765 = vmatprep.subr.bf16.mxu0 %v1764_v60  ;;  %1243 = vmatpush1.msra.mxu1 %v2637_v23  ;;  %v1766_v33 = vpack.c.bf16 %v1074_v24, %v1062_v51  ;;  %v1768_v59 = vpack.c.bf16 %v1092_v1, %v1080_v43  ;;  %v1109_v36 = vsub.f32 %v2589_v15, %v1108_v11  ;;  %v1086_v34 = vand.u32 4294901760, %v1085_v35 }
 0x212   : > { %1793 = vmatprep.subr.bf16.mxu1 %v2490_v63  ;;  %1293 = vmatmul.mubr.f32.vlgmr.msra.gmra.mrb[0].mxu1 %v2445_v17  ;;  %v1104_v53 = vand.u32 4294901760, %v1103_v40  ;;  %v1132_v51 = vand.u32 4294901760, %v2637_v23  ;;  %v1122_v45 = vand.u32 4294901760, %v1121_v62  ;;  %v1127_v24 = vsub.f32 %v2612_v10, %v1126_v32 }
 0x213   : > { %1795 = vmatpush1.bf16.msra.mxu1 %v2486_v55  ;;  %v1770_v6 = vpack.c.bf16 %v1098_v38, %v1086_v34  ;;  %1381 = vmatprep.mubr.f32.mxu1 %v2106_v0  ;;  %v1110_v60 = vand.u32 4294901760, %v1109_v36  ;;  %v1810_v10 = vpack.c.bf16 %v1048_v4, %v1036_v31  ;;  %v1812_v62 = vpack.c.bf16 %v1066_v46, %v1054_v20 }
 0x214   : > { %1767 = vmatpush1.bf16.msra.mxu0 %v1766_v33  ;;  %1797 = vmatprep.subr.bf16.mxu1 %v2503_v7  ;;  %v1772_v41 = vpack.c.bf16 %v1116_v16, %v1104_v53  ;;  %v1133_v35 = vsub.f32 %v2637_v23, %v1132_v51  ;;  %v1128_v43 = vand.u32 4294901760, %v1127_v24  ;;  %v1808_v23 = vpack.c.bf16 %v1042_v13, %v1030_v49 }
 0x215   : > { %1769 = vmatprep.subr.bf16.mxu0 %v1768_v59  ;;  %v1774_v1 = vpack.c.bf16 %v1122_v45, %v1110_v60  ;;  %v2795_v50 = vand.u32 4294901760, %v2506_v14  ;;  %v2796_v58 = vand.u32 4294901760, %v2514_v21  ;;  %v2797_v44 = vand.u32 4294901760, %v2415_v56 }
 0x216   : > { %v1134_v40 = vand.u32 4294901760, %v1133_v35  ;;  %v2798_v4 = vand.u32 4294901760, %v2526_v37  ;;  %v1820_v14 = vpack.c.bf16 %v1114_v26, %v1102_v39  ;;  %v1822_v56 = vpack.c.bf16 %v1120_v27, %v1108_v11 }
 0x217   : > { %1799 = vmatpush1.bf16.msra.mxu1 %v2519_v29  ;;  %v1814_v13 = vpack.c.bf16 %v2796_v58, %v2795_v50 }
 0x218   : > { %1771 = vmatpush1.bf16.msra.mxu0 %v1770_v6  ;;  %1801 = vmatprep.subr.bf16.mxu1 %v2535_v48  ;;  %v1816_v17 = vpack.c.bf16 %v2798_v4, %v2797_v44 }
 0x219   : > { %1773 = vmatprep.subr.bf16.mxu0 %v1772_v41 }
 0x21b   : > { %1803 = vmatpush1.bf16.msra.mxu1 %v2541_v57 }
 0x21c   : > { %1775 = vmatpush1.bf16.msra.mxu0 %v1774_v1  ;;  %1805 = vmatprep.subr.bf16.mxu1 %v2564_v22 }
 0x21d   : > { %1129 = vmatprep.subr.mxu0 %v1128_v43 }
 0x21f   : > { %1807 = vmatpush1.bf16.msra.mxu1 %v2550_v9 }
 0x220   : > { %1135 = vmatpush1.msra.mxu0 %v1134_v40  ;;  %1332 = vmatprep.subr.mxu1 %v2584_v30 }
 0x221   : > { %1184 = vmatmul.mubr.f32.vlgmr.msra.gmra.mrb[2].mxu0 %v2419_v61 }
 0x223   : > { %1334 = vmatpush1.msra.mxu1 %v2609_v28 }
 0x224   : > { %1809 = vmatprep.subr.bf16.mxu1 %v1808_v23  ;;  %1385 = vmatmul.mubr.f32.vlgmr.msra.gmra.mrb[0].mxu1 %v1019_v47  ;;  %v2799_v47 = vand.u32 4294901760, %v2543_v42 }
 0x225   : > { %1811 = vmatpush1.bf16.msra.mxu1 %v1810_v10  ;;  %1509 = vmatprep.mubr.f32.mxu1 %v2106_v0 }
 0x226   : > { %1813 = vmatprep.subr.bf16.mxu1 %v1812_v62  ;;  %v1818_v54 = vpack.c.bf16 %v2799_v47, %v1084_v8  ;;  %v928_v8 = vpop.permute.xlu1 %927 }
 0x229   : > { %1815 = vmatpush1.bf16.msra.mxu1 %v1814_v13 }
 0x22a   : > { %1817 = vmatprep.subr.bf16.mxu1 %v1816_v17 }
 0x22d   : > { %1819 = vmatpush1.bf16.msra.mxu1 %v1818_v54 }
 0x22e   : > { %1821 = vmatprep.subr.bf16.mxu1 %v1820_v14 }
 0x231   : > { %1823 = vmatpush1.bf16.msra.mxu1 %v1822_v56 }
 0x232   : > { %1458 = vmatprep.subr.mxu1 %v1126_v32 }
 0x235   : > { %1462 = vmatpush1.msra.mxu1 %v1132_v51 }
 0x236   : > { %1825 = vmatprep.subr.bf16.mxu1 %v2490_v63  ;;  %1511 = vmatmul.mubr.f32.vlgmr.msra.gmra.mrb[0].mxu1 %v2419_v61 }
 0x237   : > { %1827 = vmatpush1.bf16.msra.mxu1 %v2486_v55  ;;  %1599 = vmatprep.mubr.f32.mxu1 %v2106_v0 }
 0x238   : > { %1829 = vmatprep.subr.bf16.mxu1 %v2503_v7 }
 0x23b   : > { %1831 = vmatpush1.bf16.msra.mxu1 %v2519_v29 }
 0x23c   : > { %1833 = vmatprep.subr.bf16.mxu1 %v2535_v48 }
 0x23f   : > { %1835 = vmatpush1.bf16.msra.mxu1 %v2541_v57 }
 0x240   : > { %1837 = vmatprep.subr.bf16.mxu1 %v2564_v22 }
 0x243   : > { %1839 = vmatpush1.bf16.msra.mxu1 %v2550_v9 }
 0x244   : > { %1550 = vmatprep.subr.mxu1 %v2584_v30 }
 0x247   : > { %1552 = vmatpush1.msra.mxu1 %v2609_v28 }
 0x248   : > { %1601 = vmatmul.mubr.f32.vlgmr.msra.gmra.mrb[0].mxu1 %v2419_v61 }
 0x2f4   : > { %v1185_v0 = vpop.f32.mrb[2].mxu0 }
 0x2f5   : > { %v1187_v52 = vpop.f32.mrb[3].mxu0  ;;  %v1842_v11 = vadd.f32 %v1185_v0, %v928_v8 }
 0x2f6   : > { %v1844_v55 = vadd.f32 %v1187_v52, %v928_v8 }
 0x31b   : > { %v1602_v63 = vpop.f32.mrb[0].mxu1 }
 0x31c   : > { %v1843_v7 = vadd.f32 %v1842_v11, %v1602_v63  ;;  %v1604_v18 = vpop.f32.mrb[1].mxu1 }
 0x31d   : > { %v1845_v19 = vadd.f32 %v1844_v55, %v1604_v18 }
 0x31e   : > { %v1607_v20 = vadd.f32 %v1843_v7, %v2331_v3 }
 0x31f   : > { %v1608_v21 = vadd.f32 %v1845_v19, %v2329_v2 }
 0x320   : > { %v1609_v61 = vmax.f32 %v1607_v20, 0.0 }
 0x321   : > { %v1610_v29 = vmax.f32 %v1608_v21, 0.0 }
 0x322   : > { %1611 = vst [vmem:[%s265_s16] sm:$0xff] %v1609_v61 }
 0x323   : > { %1612 = vst [vmem:[%s265_s16 + $0x8] sm:$0xff] %v1610_v29 }
 0x324   : > { %2044 = shalt.err (!%p2041_p7)
}
 0x325   : > { %s2045_s28 = scalar_lea.hbm %s2726_s11, 256  ;;  %s2049_s9 = scalar_lea.hbm %s2775_s5, 512 }
 0x326   : > { %p2046_p10 = scmp.ne.s32.totalorder %s2726_s11, %s2045_s28  ;;  %p2050_p0 = scmp.lt.u32.totalorder %s2726_s11, %s2775_s5 }
 0x327   : > { %p2051_p11 = scmp.lt.u32.totalorder %s2049_s9, %s2045_s28  ;;  %p2053_p2 = scmp.lt.u32.totalorder %s2045_s28, %s2726_s11 }
 0x328   : > { %p2047_p13 = pnand %p2046_p10, %p2267_p6 }
 0x329   : > { %p2052_p9 = por %p2051_p11, %p2050_p0 }
 0x32a   : > { %p2048_p5 = pneg %p2047_p13 }
 0x32b   : > { %p2054_p1 = por %p2053_p2, %p2052_p9 }
 0x32d   : > { %p2055_p4 = pnand %p2054_p1, %p2048_p5 }
 0x32f   : > { %2058 = shalt.err (!%p2055_p4)
}
 0x330   : > { %1874 = dma.vmem_to_hbm [thread:$0]  (%p2267_p6), %s2728_s24, 256, %s2726_s11, %s1614_s22  }
 0x331 PF: > { %s1640_s15 = sand.u32 1, %s2089_s18   ;;  %p2800_p8 = scmp.ne.s32.totalorder %s2785_s25, 0 }
 0x332   : > { %p2801_p12 = scmp.ge.s32.totalorder %s2101_s21, 2  ;;  %s1641_s16 = scalar_lea.sflag [#allocation4], %s1640_s15 }
 0x334   : > { %p1888_p3 = pnand %p2801_p12, %p2800_p8 }
 0x336   : > { %2084 = dma.done.wait (!%p1888_p3), %s1641_s16, 256  }
 0x337   : > { %2086 = vsyncadd (!%p1888_p3), %s1641_s16, 4294967040  ;;  %p19_p7 = scmp.ge.s32.totalorder %s2204_s7, 4   ;;  %s2802_s18 = smov %s2093_s19 }
 0x338   : > { %s2803_s19 = smov %s2097_s20  ;;  %s2804_s20 = smov %s2263_s6 }
 0x339   : > { %s2805_s21 = smov %s2204_s7  ;;  %21 = sbr.rel (!%p19_p7) target bundleno = 6 (0x6), region = 100 }
 0x340   :  { %1646 = vsyncpa [#allocation3], 1 }
 0x341   :  { %1648 = vsyncpa [#allocation3 + $0x1], 1 }
 0x342   :  { %1649 = vsyncpa [#allocation6], 1 }
 0x343   :  { %1650 = vsyncpa [#allocation4], 1 }
 0x344   :  { %1652 = vsyncpa [#allocation4 + $0x1], 1 }

</bundles_post_ra>
